<compile_context>
chip_gen: v7x
topology: tpu7x:2x2x1
jax: 0.10.0
libtpu: 0.0.40
codegen_flags: <defaults>
</compile_context>

<pallas_src>
import functools

import jax
import jax.numpy as jnp
import numpy as np
from jax import lax
from jax.scipy.special import logsumexp
from jax.experimental import pallas as pl
from jax.experimental.pallas import tpu as pltpu


# ------------------- parameter glue (plain JAX, mirrors the torch code) -------------------

def _is_normalized2d(t, rtol=1e-5, atol=1e-8):
    # mirrors torch.allclose(t.sum(-1), ones) and torch.allclose(t.sum(-2), ones)
    c1 = jnp.all(jnp.abs(t.sum(-1) - 1.0) <= atol + rtol * 1.0)
    c2 = jnp.all(jnp.abs(t.sum(-2) - 1.0) <= atol + rtol * 1.0)
    return jnp.logical_and(c1, c2)


def log_sinkhorn(log_alpha, n_iter):
    """Incomplete Sinkhorn normalization (same early-stop semantics as torch code)."""
    def cond(state):
        la, i = state
        return jnp.logical_and(jnp.logical_not(_is_normalized2d(jnp.exp(la))), i < n_iter)

    def body(state):
        la, i = state
        la = la - logsumexp(la, axis=-1, keepdims=True)
        la = la - logsumexp(la, axis=-2, keepdims=True)
        return la, i + 1

    la, _ = lax.while_loop(cond, body, (log_alpha, jnp.int32(0)))
    return jnp.exp(la)


def get_W(weight, representations, *, out_channels, in_channels, kernel_size, group_size, n_iter):
    """WSLiftConv2d.get_W(): Sinkhorn + einsum weight construction (plain JAX)."""
    rep = log_sinkhorn(representations, n_iter)                      # (g, k*k, k*k)
    kern = jnp.einsum('gnm,oim->ogin', rep, weight)                  # (O, g, I, k*k)
    kern = kern.reshape(out_channels * group_size, in_channels, kernel_size * kernel_size)
    return kern.reshape(out_channels * group_size, in_channels, kernel_size, kernel_size)


# ----------------------------- Pallas kernel (conv hot path) -----------------------------

def _round_up(x, m):
    return (x + m - 1) // m * m


def _lift_conv_kernel(x_ref, w_ref, b_ref, o_ref, *, offsets, tile_n, win_n):
    # x_ref: (Cin_pad, N_in_img)   one image's zero-padded input: channels on sublanes,
    #                              padded spatial grid flattened on lanes (+ halo slack)
    # w_ref: (Cout, kk*Cin_pad)    tap-folded weight matrix
    # b_ref: (Cout, 1)             f32 bias column (already expanded over the group axis)
    # o_ref: (Cout, tile_n)        lane-dense output tile on the virtual padded grid
    base = pl.multiple_of(pl.program_id(1) * tile_n, 128)    # 128-aligned dynamic window start
    window = x_ref[:, pl.ds(base, win_n)]                    # (Cin_pad, win_n)
    # Stack the k*k shifted views on sublanes -> one deep MXU contraction (kk*Cin_pad).
    stacked = jnp.concatenate([window[:, off:off + tile_n] for off in offsets], axis=0)
    acc = jnp.broadcast_to(b_ref[...], o_ref.shape).astype(jnp.float32)   # bias-initialized acc
    acc = acc + jnp.dot(w_ref[...], stacked, preferred_element_type=jnp.float32)
    o_ref[...] = acc.astype(o_ref.dtype)


def wslift_conv2d_forward(x, weight, representations, bias, *, in_channels, out_channels,
                          kernel_size, group_size, n_iter, padding,
                          compute_dtype=jnp.bfloat16, out_dtype=jnp.float32, tile_n=None):
    B, Cin, H, W = x.shape
    assert Cin == in_channels
    k = kernel_size
    g = group_size
    Cout = out_channels * g
    kk = k * k
    Cin_pad = _round_up(Cin, 8)          # sublane-aligned per-tap channel slab
    KKC = kk * Cin_pad

    # --- weight construction (parameter setup, plain JAX) ---
    W_conv = get_W(weight, representations, out_channels=out_channels,
                   in_channels=in_channels, kernel_size=k, group_size=g, n_iter=n_iter)

    Hp, Wp = H + 2 * padding, W + 2 * padding
    H_out, W_out = Hp - k + 1, Wp - k + 1
    N_img = Hp * Wp
    off_max = (k - 1) * Wp + (k - 1)

    if tile_n is None:
        tile_n = min(2048, _round_up(N_img, 128))
    assert tile_n % 128 == 0
    n_tiles = -(-N_img // tile_n)
    N_out_img = n_tiles * tile_n                  # lane-dense per-image output width
    halo = _round_up(off_max, 128)
    win_n = tile_n + halo                         # per-tile input window (aligned start)
    N_in_img = N_out_img + halo                   # per-image input width incl. tap slack

    # --- input staging: (B, Cin_pad, N_in_img), channels on sublanes, space on lanes ---
    # TODO(synk): fold the zero-padding / final crop into the kernel (zero-initialized
    # VMEM scratch + row DMAs) to remove these wrapper HBM passes for large inputs.
    x_pad = jnp.pad(x, ((0, 0), (0, Cin_pad - Cin),
                        (padding, padding), (padding, padding)))
    x_flat = x_pad.reshape(B, Cin_pad, N_img)
    x_flat = jnp.pad(x_flat, ((0, 0), (0, 0), (0, N_in_img - N_img))).astype(compute_dtype)

    # --- tap-folded weights: (Cout, kk*Cin_pad), row q = tap*Cin_pad + channel ---
    w_taps = jnp.pad(W_conv.transpose(0, 2, 3, 1),            # (Cout, k, k, Cin)
                     ((0, 0), (0, 0), (0, 0), (0, Cin_pad - Cin)))
    w_flat = w_taps.reshape(Cout, KKC).astype(compute_dtype)

    if bias is not None:
        bias_col = jnp.repeat(bias.reshape(out_channels), g).reshape(Cout, 1)
    else:
        bias_col = jnp.zeros((Cout, 1), jnp.float32)
    bias_col = bias_col.astype(jnp.float32)

    # lane offset of each filter tap in the per-image flat buffer
    offsets = tuple(kh * Wp + kw for kh in range(k) for kw in range(k))

    # --- generation-aware VMEM budget (v7x: 64 MiB/TC total; v5e/v6e: 128 MiB) ---
    try:
        vmem_cap = int(pltpu.get_tpu_info().vmem_capacity_bytes)
    except Exception:
        vmem_cap = 64 * 1024 * 1024
    vmem_limit = max(16 * 1024 * 1024, min(64 * 1024 * 1024, vmem_cap // 2))

    itemsize = jnp.dtype(compute_dtype).itemsize
    out_itemsize = jnp.dtype(out_dtype).itemsize
    cost = pl.CostEstimate(
        flops=2 * B * n_tiles * Cout * KKC * tile_n,
        transcendentals=0,
        bytes_accessed=B * Cin_pad * N_in_img * itemsize
                       + Cout * KKC * itemsize + Cout * 4
                       + B * Cout * N_out_img * out_itemsize,
    )

    out_flat = pl.pallas_call(
        functools.partial(_lift_conv_kernel, offsets=offsets, tile_n=tile_n, win_n=win_n),
        out_shape=jax.ShapeDtypeStruct((B, Cout, N_out_img), out_dtype),
        grid_spec=pltpu.PrefetchScalarGridSpec(
            num_scalar_prefetch=0,
            grid=(B, n_tiles),
            in_specs=[
                # per-image input block; block index constant in j -> fetched once per image
                pl.BlockSpec((None, Cin_pad, N_in_img), lambda b, j: (b, 0, 0)),
                pl.BlockSpec((Cout, KKC), lambda b, j: (0, 0)),
                pl.BlockSpec((Cout, 1), lambda b, j: (0, 0)),
            ],
            out_specs=pl.BlockSpec((None, Cout, tile_n), lambda b, j: (b, 0, j)),
        ),
        compiler_params=pltpu.CompilerParams(
            dimension_semantics=("parallel", "parallel"),   # independent tiles; v7x 2-TC sharding
            vmem_limit_bytes=vmem_limit,
        ),
        cost_estimate=cost,
    )(x_flat, w_flat, bias_col)

    # crop the virtual padded-width grid back to the valid output and restore NCHW
    out = out_flat[:, :, :N_img].reshape(B, Cout, Hp, Wp)[:, :, :H_out, :W_out]
    out = out.reshape(B, out_channels, g, H_out, W_out)
    return out


# ----------------------------------------- driver -----------------------------------------

if __name__ == "__main__":
    B = 2
    in_channels = 4
    out_channels = 4
    group_size = 4
    kernel_size = 3
    padding = 1
    n_iter = 20
    H = W = 16
    d_in = kernel_size ** 2

    key = jax.random.PRNGKey(0)
    k_w, k_rep, k_x = jax.random.split(key, 3)

    # kaiming_normal_(a=sqrt(5)) on (O, I, k*k): std = sqrt(2/(1+a^2)) / sqrt(fan_in)
    fan_in = in_channels * d_in
    std = float(np.sqrt(2.0 / 6.0) / np.sqrt(fan_in))
    weight = std * jax.random.normal(k_w, (out_channels, in_channels, d_in), dtype=jnp.float32)
    # init_mode='rand' -> torch.rand in [0, 1)
    representations = jax.random.uniform(k_rep, (group_size, d_in, d_in), dtype=jnp.float32)
    bias = jnp.zeros((out_channels, 1, 1, 1), jnp.float32)            # init.zeros_

    x = jax.random.normal(k_x, (B, in_channels, H, W), dtype=jnp.float32)

    fwd = jax.jit(functools.partial(
        wslift_conv2d_forward, in_channels=in_channels, out_channels=out_channels,
        kernel_size=kernel_size, group_size=group_size, n_iter=n_iter, padding=padding,
        tile_n=256))   # 2 lane tiles per image -> exercises the N-tiling grid path
    out = jax.block_until_ready(fwd(x, weight, representations, bias))

    # reference: identical get_W path + plain XLA conv2d at highest precision
    W_conv = get_W(weight, representations, out_channels=out_channels, in_channels=in_channels,
                   kernel_size=kernel_size, group_size=group_size, n_iter=n_iter)
    ref = lax.conv_general_dilated(
        x, W_conv, window_strides=(1, 1),
        padding=((padding, padding), (padding, padding)),
        dimension_numbers=('NCHW', 'OIHW', 'NCHW'),
        precision=lax.Precision.HIGHEST)
    Ho = H + 2 * padding - kernel_size + 1
    ref = ref.reshape(B, out_channels, group_size, Ho, Ho) + bias[None]

    assert out.shape == (B, out_channels, group_size, Ho, Ho), out.shape
    # tolerance sized for bf16 MXU inputs with f32 accumulation vs f32 HIGHEST reference
    np.testing.assert_allclose(np.asarray(out), np.asarray(ref), atol=3e-3, rtol=3e-3)
    print("KERNEL_OK")
</pallas_src>

<mosaic_0001>
module attributes {stable_mosaic.version = 11 : i64} {
  func.func @_lift_conv_kernel(%arg0: i32, %arg1: i32, %arg2: memref<1x8x640xbf16, #tpu.memory_space<vmem>>, %arg3: memref<16x72xbf16, #tpu.memory_space<vmem>>, %arg4: memref<16x1xf32, #tpu.memory_space<vmem>>, %arg5: memref<1x16x256xf32, #tpu.memory_space<vmem>>) attributes {dimension_semantics = [#tpu.dimension_semantics<parallel>, #tpu.dimension_semantics<parallel>], iteration_bounds = array<i64: 2, 2>, scalar_prefetch = 0 : i64, scratch_operands = 0 : i64, tpu.core_type = #tpu.core_type<tc>, window_params = [{transform_indices = @transform_0, window_bounds = array<i64: 1, 8, 640>}, {pipeline_mode = #tpu.pipeline_mode<synchronous>, transform_indices = @transform_1, window_bounds = array<i64: 16, 72>}, {pipeline_mode = #tpu.pipeline_mode<synchronous>, transform_indices = @transform_2, window_bounds = array<i64: 16, 1>}, {transform_indices = @transform_3, window_bounds = array<i64: 1, 16, 256>}]} {
    %c256_i32 = arith.constant 256 : i32
    %0 = arith.muli %arg1, %c256_i32 : i32
    %1 = tpu.assume_multiple %0, 128 : i32
    %c0 = arith.constant 0 : index
    %c0_0 = arith.constant 0 : index
    %2 = arith.index_cast %1 : i32 to index
    %3 = vector.load %arg2[%c0, %c0_0, %2] : memref<1x8x640xbf16, #tpu.memory_space<vmem>>, vector<1x8x384xbf16>
    %4 = vector.shape_cast %3 : vector<1x8x384xbf16> to vector<8x384xbf16>
    %5 = vector.extract_strided_slice %4 {offsets = [0, 0], sizes = [8, 256], strides = [1, 1]} : vector<8x384xbf16> to vector<8x256xbf16>
    %6 = vector.extract_strided_slice %4 {offsets = [0, 1], sizes = [8, 256], strides = [1, 1]} : vector<8x384xbf16> to vector<8x256xbf16>
    %7 = vector.extract_strided_slice %4 {offsets = [0, 2], sizes = [8, 256], strides = [1, 1]} : vector<8x384xbf16> to vector<8x256xbf16>
    %8 = vector.extract_strided_slice %4 {offsets = [0, 18], sizes = [8, 256], strides = [1, 1]} : vector<8x384xbf16> to vector<8x256xbf16>
    %9 = vector.extract_strided_slice %4 {offsets = [0, 19], sizes = [8, 256], strides = [1, 1]} : vector<8x384xbf16> to vector<8x256xbf16>
    %10 = vector.extract_strided_slice %4 {offsets = [0, 20], sizes = [8, 256], strides = [1, 1]} : vector<8x384xbf16> to vector<8x256xbf16>
    %11 = vector.extract_strided_slice %4 {offsets = [0, 36], sizes = [8, 256], strides = [1, 1]} : vector<8x384xbf16> to vector<8x256xbf16>
    %12 = vector.extract_strided_slice %4 {offsets = [0, 37], sizes = [8, 256], strides = [1, 1]} : vector<8x384xbf16> to vector<8x256xbf16>
    %13 = vector.extract_strided_slice %4 {offsets = [0, 38], sizes = [8, 256], strides = [1, 1]} : vector<8x384xbf16> to vector<8x256xbf16>
    %14 = tpu.concatenate %5, %6, %7, %8, %9, %10, %11, %12, %13 in 0 : vector<8x256xbf16>, vector<8x256xbf16>, vector<8x256xbf16>, vector<8x256xbf16>, vector<8x256xbf16>, vector<8x256xbf16>, vector<8x256xbf16>, vector<8x256xbf16>, vector<8x256xbf16> -> vector<72x256xbf16>
    %c0_1 = arith.constant 0 : index
    %c0_2 = arith.constant 0 : index
    %15 = vector.load %arg4[%c0_1, %c0_2] : memref<16x1xf32, #tpu.memory_space<vmem>>, vector<16x1xf32>
    %16 = vector.shape_cast %15 : vector<16x1xf32> to vector<16x1xf32>
    %17 = vector.broadcast %16 : vector<16x1xf32> to vector<16x256xf32>
    %c0_3 = arith.constant 0 : index
    %c0_4 = arith.constant 0 : index
    %18 = vector.load %arg3[%c0_3, %c0_4] : memref<16x72xbf16, #tpu.memory_space<vmem>>, vector<16x72xbf16>
    %cst = arith.constant dense<0.000000e+00> : vector<16x256xf32>
    %19 = tpu.matmul %18, %14, %cst {dimension_numbers = #tpu.dot_dimension_numbers<[1], [0], [0], [1], [0, 0, 1, 1], [], []>} : vector<16x72xbf16>, vector<72x256xbf16>, vector<16x256xf32> -> vector<16x256xf32>
    %20 = arith.addf %17, %19 : vector<16x256xf32>
    %c0_5 = arith.constant 0 : index
    %c0_6 = arith.constant 0 : index
    %c0_7 = arith.constant 0 : index
    %21 = vector.load %arg5[%c0_5, %c0_6, %c0_7] : memref<1x16x256xf32, #tpu.memory_space<vmem>>, vector<1x16x256xf32>
    %22 = vector.shape_cast %21 : vector<1x16x256xf32> to vector<16x256xf32>
    %23 = vector.shape_cast %20 : vector<16x256xf32> to vector<1x16x256xf32>
    tpu.vector_store %arg5[%c0_5, %c0_6, %c0_7], %23 {strides = array<i32>} : memref<1x16x256xf32, #tpu.memory_space<vmem>>, vector<1x16x256xf32>,
    return
  }
  func.func @transform_0(%arg0: i32, %arg1: i32) -> (i32, i32, i32) {
    %c0_i32 = arith.constant 0 : i32
    %c0_i32_0 = arith.constant 0 : i32
    %c0_i32_1 = arith.constant 0 : i32
    return %arg0, %c0_i32, %c0_i32_0 : i32, i32, i32
  }
  func.func @transform_1(%arg0: i32, %arg1: i32) -> (i32, i32) {
    %c0_i32 = arith.constant 0 : i32
    %c0_i32_0 = arith.constant 0 : i32
    %c0_i32_1 = arith.constant 0 : i32
    return %c0_i32, %c0_i32_0 : i32, i32
  }
  func.func @transform_2(%arg0: i32, %arg1: i32) -> (i32, i32) {
    %c0_i32 = arith.constant 0 : i32
    %c0_i32_0 = arith.constant 0 : i32
    %c0_i32_1 = arith.constant 0 : i32
    return %c0_i32, %c0_i32_0 : i32, i32
  }
  func.func @transform_3(%arg0: i32, %arg1: i32) -> (i32, i32, i32) {
    %c0_i32 = arith.constant 0 : i32
    %c0_i32_0 = arith.constant 0 : i32
    return %arg0, %c0_i32, %arg1 : i32, i32, i32
  }
}

</mosaic_0001>

<bundles_post_ra>
// kernel: wslift_conv2d_forward.1
= control target key start
LH: loop header
LB: loop body
LE: loop exit
PB: predicated region body
PF: predicated region fallthrough
CT: control target
= control target key end

     0   :  { %s661_s12 = smov 0   ;;  %s663_s13 = smov 0   ;;  %s774_s0 = inlined_call_operand.vmem [shape: bf16[2,8,640], index: 0, kind: input, shape index: {}]   ;;  %s775_s1 = inlined_call_operand.vmem [shape: bf16[16,72], index: 1, kind: input, shape index: {}]   ;;  %s776_s2 = inlined_call_operand.vmem [shape: f32[16,1], index: 2, kind: input, shape index: {}]   ;;  %s777_s3 = inlined_call_operand.vmem [shape: f32[2,16,512], index: 3, kind: output, shape index: {}]  }
   0x1   :  { %s665_s14 = smov 0   ;;  %s667_s15 = smov 0  }
   0x2   :  { %s669_s16 = smov 0   ;;  %s671_s17 = smov 0  }
   0x3   :  { %s673_s18 = smov 0  }
   0x4 LB: > { %s22_s19 = sadd.s32 1, %s622_s16  ;;  %s25_s20 = sadd.s32 1, %s626_s17  ;;  %s630_s18 = sphi %s673_s18, %s13_s18   ;;  %s626_s17 = sphi %s671_s17, %s784_s17   ;;  %s622_s16 = sphi %s669_s16, %s783_s16   ;;  %s618_s15 = sphi %s667_s15, %s782_s15   ;;  %s614_s14 = sphi %s665_s14, %s781_s14   ;;  %s610_s13 = sphi %s663_s13, %s780_s13   ;;  %s606_s12 = sphi %s661_s12, %s779_s12  }
   0x5   : > { %p23_p0 = scmp.ge.s32.totalorder %s22_s19, 2  ;;  %s483_s21 = sadd.s32 4294967295, %s630_s18  }
   0x6   : > { %p112_p1 = scmp.ne.s32.totalorder %s610_s13, %s606_s12  ;;  %p113_p2 = scmp.eq.s32.totalorder %s483_s21, 3 }
   0x7   : > { %s786_s19 = smov (%p23_p0, %s22_s19), 0  ;;  %s788_s20 = smov (!%p23_p0, %s25_s20), %s626_s17 }
   0x8   : > { %s98_s22 = ssub.s32 %s622_s16, %s786_s19  ;;  %p27_p3 = scmp.ge.s32.totalorder %s788_s20, 2 }
   0x9   : > { %p487_p4 = scmp.ge.s32.totalorder %s630_s18, 1  ;;  %p707_p5 = por %p113_p2, %p112_p1 }
   0xa   : > { %p151_p6 = scmp.lt.s32.totalorder %s630_s18, 5  ;;  %s790_s20 = smov (%p27_p3, %s788_s20), 0 }
   0xb   : > { %s97_s24 = ssub.s32 %s626_s17, %s790_s20  ;;  %s102_s26 = sadd.s32 1, %s610_s13 }
   0xc   : > { %p152_p7 = pnand %p487_p4, %p151_p6  ;;  %s99_s25 = sor.u32 %s98_s22, %s97_s24 }
   0xd   : > { %p100_p8 = scmp.eq.s32.totalorder %s99_s25, 0  ;;  %p174_p9 = scmp.lt.s32.totalorder (!%p152_p7), %s618_s15, 1  ;;  %v639_v4 = vmov (!%p152_p7), 0   ;;  %v301_v5 = vld [vmem:[%s776_s2] sm:$0xff] (!%p152_p7)  ;;  %v302_v6 = vld [vmem:[%s776_s2 + $0x8] sm:$0xff] (!%p152_p7)  ;;  %vm202_vm0 = vcmask (!%p152_p7), 1039360  }
   0xe   : > { %155 = sbr.rel (%p152_p7) target bundleno = 420 (0x1a4), region = 32  ;;  %s490_s28 = sshll.u32 (!%p152_p7), %s614_s14, 8  ;;  %362 = vmatprep.mubr.bf16.mxu0 (!%p152_p7), %v639_v4  ;;  %570 = vset.pattern.permute.xlu0 (!%p152_p7), %v639_v4  ;;  %vm268_vm1 = vcmask (!%p152_p7), 1043456   ;;  %vm211_vm2 = vcmask (!%p152_p7), 1031168   ;;  %vm220_vm3 = vcmask (!%p152_p7), 900096   ;;  %vm229_vm4 = vcmask (!%p152_p7), 891904  }
   0xf   : > { %s718_s27 = scalar_select %p100_p8, %s610_s13, %s102_s26  }
  0x10   : > { %s182_s29 = sshra.s32 (!%p152_p7), %s490_s28, 7  ;;  %s632_s10 = smov (!%p152_p7), 127   ;;  %571 = vset.pattern.permute.xlu1 (!%p152_p7), %v639_v4  ;;  %vm238_vm5 = vcmask (!%p152_p7), 883712   ;;  %vm247_vm6 = vcmask (!%p152_p7), 752640   ;;  %vm256_vm7 = vcmask (!%p152_p7), 744448   ;;  %vm265_vm8 = vcmask (!%p152_p7), 736256  }
  0x11   : > { %s491_s5 = sshll.u32 (!%p152_p7), %s182_s29, 2  ;;  %s633_s11 = smov (!%p152_p7), 126   ;;  %v575_v56 = vld [vmem:[%s775_s1] sm:$0xff] (!%p152_p7)   ;;  %vm320_vm9 = vcmask (!%p152_p7), 588800  }
  0x12   : > { %s634_s21 = smov (!%p152_p7), 110   ;;  %s635_s22 = smov (!%p152_p7), 109  }
  0x13   : > { %s636_s24 = smov (!%p152_p7), 108   ;;  %s637_s25 = smov (!%p152_p7), 92  }
  0x14   : > { %s638_s26 = smov (!%p152_p7), 91   ;;  %s640_s28 = smov (!%p152_p7), 90  }
  0x15   : > { %s175_s30 = scalar_select %p174_p9, %s618_s15, 1 }
  0x17   : > { %s504_s4 = smul.u32 20, %s175_s30 }
  0x19   : > { %s178_s8 = scalar_lea.vmem %s774_s0, %s504_s4 }
  0x1a   : > { %s185_s9 = scalar_lea.vmem %s178_s8, %s491_s5  ;;  %s171_s8 = sand.u32 1, %s606_s12  }
  0x1b   : > { %v186_v0 = vld [vmem:[%s185_s9] sm:$0xff]  ;;  %v574_v3 = vld [vmem:[%s185_s9 + $0x8] ss:$0 sps:$4 sm:$0xff]   ;;  %s488_s9 = sshll.u32 %s171_s8, 5  ;;  %s499_s12 = sshll.u32 (%p707_p5), %s614_s14, 1 }
  0x1c   : > { %v493_v1 = vcombine.high %v186_v0, %v186_v0  ;;  %v492_v2 = vcombine.low %v186_v0, %v186_v0 }
  0x1e   : > { %198 = vrot.lane.b32.xlu0 %v493_v1, %s632_s10  ;;  %196 = vrot.lane.b32.xlu1 %v492_v2, %s632_s10 }
  0x22   : > { %200 = vrot.lane.b32.xlu0 %v574_v3, %s632_s10  ;;  %207 = vrot.lane.b32.xlu1 %v493_v1, %s633_s11  ;;  %s173_s10 = scalar_lea.vmem [#allocation2], %s488_s9 }
  0x26   : > { %209 = vrot.lane.b32.xlu0 %v574_v3, %s633_s11  ;;  %216 = vrot.lane.b32.xlu1 %v493_v1, %s634_s21 }
  0x2a   : > { %218 = vrot.lane.b32.xlu0 %v574_v3, %s634_s21  ;;  %205 = vrot.lane.b32.xlu1 %v492_v2, %s633_s11  ;;  %s500_s11 = sshll.u32 (%p707_p5), %s618_s15, 3 }
  0x2e   : > { %214 = vrot.lane.b32.xlu0 %v492_v2, %s634_s21  ;;  %225 = vrot.lane.b32.xlu1 %v493_v1, %s635_s22  ;;  %s390_s21 = sadd.s32 (%p707_p5), %s500_s11, %s499_s12 }
  0x32   : > { %227 = vrot.lane.b32.xlu0 %v574_v3, %s635_s22  ;;  %234 = vrot.lane.b32.xlu1 %v493_v1, %s636_s24 }
  0x36   : > { %236 = vrot.lane.b32.xlu0 %v574_v3, %s636_s24  ;;  %223 = vrot.lane.b32.xlu1 %v492_v2, %s635_s22  ;;  %s501_s22 = sshll.u32 (%p707_p5), %s390_s21, 3 }
  0x3a   : > { %232 = vrot.lane.b32.xlu0 %v492_v2, %s636_s24  ;;  %243 = vrot.lane.b32.xlu1 %v493_v1, %s637_s25 }
  0x3e   : > { %245 = vrot.lane.b32.xlu0 %v574_v3, %s637_s25  ;;  %252 = vrot.lane.b32.xlu1 %v493_v1, %s638_s26 }
  0x42   : > { %254 = vrot.lane.b32.xlu0 %v574_v3, %s638_s26  ;;  %241 = vrot.lane.b32.xlu1 %v492_v2, %s637_s25 }
  0x46   : > { %250 = vrot.lane.b32.xlu0 %v492_v2, %s638_s26  ;;  %259 = vrot.lane.b32.xlu1 %v492_v2, %s640_s28  ;;  %s392_s26 = scalar_lea.vmem (%p707_p5), %s777_s3, %s501_s22 }
  0x4a   : > { %261 = vrot.lane.b32.xlu0 %v493_v1, %s640_s28  ;;  %263 = vrot.lane.b32.xlu1 %v574_v3, %s640_s28 }
  0x4e   : > { %305 = vperm.xlu0 %570, %v301_v5   ;;  %310 = vperm.xlu1 %571, %v302_v6  }
  0x90   : > { %v199_v7 = vpop.permute.xlu0 %198  ;;  %v197_v8 = vpop.permute.xlu1 %196 }
  0x91   : > { %v203_v9 = vsel %vm202_vm0, %v197_v8, %v199_v7 }
  0x92   : > { %v271_v14 = vsel %vm268_vm1, %v492_v2, %v203_v9 }
  0x94   : > { %v201_v10 = vpop.permute.xlu0 %200  ;;  %v208_v11 = vpop.permute.xlu1 %207 }
  0x95   : > { %v204_v12 = vsel %vm202_vm0, %v199_v7, %v201_v10 }
  0x96   : > { %v275_v13 = vsel %vm268_vm1, %v493_v1, %v204_v12 }
  0x97   : > { %330 = vmatprep.subr.bf16.mxu0 %v275_v13 }
  0x98   : > { %v210_v15 = vpop.permute.xlu0 %209  ;;  %331 = vmatpush1.bf16.msra.mxu0 %v271_v14  ;;  %v217_v16 = vpop.permute.xlu1 %216 }
  0x99   : > { %v213_v19 = vsel %vm211_vm2, %v208_v11, %v210_v15 }
  0x9c   : > { %v219_v17 = vpop.permute.xlu0 %218  ;;  %v206_v18 = vpop.permute.xlu1 %205 }
  0x9d   : > { %v222_v20 = vsel %vm220_vm3, %v217_v16, %v219_v17  ;;  %v212_v24 = vsel %vm211_vm2, %v206_v18, %v208_v11 }
  0x9e   : > { %v283_v21 = vsel %vm268_vm1, %v213_v19, %v222_v20 }
  0x9f   : > { %332 = vmatprep.subr.bf16.mxu0 %v283_v21 }
  0xa0   : > { %v215_v22 = vpop.permute.xlu0 %214  ;;  %v226_v23 = vpop.permute.xlu1 %225 }
  0xa1   : > { %v221_v25 = vsel %vm220_vm3, %v215_v22, %v217_v16 }
  0xa2   : > { %v279_v26 = vsel %vm268_vm1, %v212_v24, %v221_v25 }
  0xa3   : > { %333 = vmatpush1.bf16.msra.mxu0 %v279_v26 }
  0xa4   : > { %v228_v27 = vpop.permute.xlu0 %227  ;;  %v235_v28 = vpop.permute.xlu1 %234 }
  0xa5   : > { %v231_v31 = vsel %vm229_vm4, %v226_v23, %v228_v27 }
  0xa8   : > { %v237_v29 = vpop.permute.xlu0 %236  ;;  %v224_v30 = vpop.permute.xlu1 %223 }
  0xa9   : > { %v240_v32 = vsel %vm238_vm5, %v235_v28, %v237_v29  ;;  %v230_v36 = vsel %vm229_vm4, %v224_v30, %v226_v23 }
  0xaa   : > { %v291_v33 = vsel %vm268_vm1, %v231_v31, %v240_v32 }
  0xab   : > { %334 = vmatprep.subr.bf16.mxu0 %v291_v33 }
  0xac   : > { %v233_v34 = vpop.permute.xlu0 %232  ;;  %v244_v35 = vpop.permute.xlu1 %243 }
  0xad   : > { %v239_v37 = vsel %vm238_vm5, %v233_v34, %v235_v28 }
  0xae   : > { %v287_v38 = vsel %vm268_vm1, %v230_v36, %v239_v37 }
  0xaf   : > { %335 = vmatpush1.bf16.msra.mxu0 %v287_v38 }
  0xb0   : > { %v246_v39 = vpop.permute.xlu0 %245  ;;  %v253_v40 = vpop.permute.xlu1 %252 }
  0xb1   : > { %v249_v43 = vsel %vm247_vm6, %v244_v35, %v246_v39 }
  0xb4   : > { %v255_v41 = vpop.permute.xlu0 %254  ;;  %v242_v42 = vpop.permute.xlu1 %241 }
  0xb5   : > { %v258_v44 = vsel %vm256_vm7, %v253_v40, %v255_v41  ;;  %v248_v48 = vsel %vm247_vm6, %v242_v42, %v244_v35 }
  0xb6   : > { %v299_v45 = vsel %vm268_vm1, %v249_v43, %v258_v44 }
  0xb7   : > { %336 = vmatprep.subr.bf16.mxu0 %v299_v45 }
  0xb8   : > { %v251_v46 = vpop.permute.xlu0 %250  ;;  %v260_v47 = vpop.permute.xlu1 %259 }
  0xb9   : > { %v257_v49 = vsel %vm256_vm7, %v251_v46, %v253_v40 }
  0xba   : > { %v295_v50 = vsel %vm268_vm1, %v248_v48, %v257_v49 }
  0xbb   : > { %337 = vmatpush1.bf16.msra.mxu0 %v295_v50 }
  0xbc   : > { %v262_v51 = vpop.permute.xlu0 %261  ;;  %v264_v52 = vpop.permute.xlu1 %263 }
  0xbd   : > { %v266_v53 = vsel %vm265_vm8, %v260_v47, %v262_v51  ;;  %v267_v54 = vsel %vm265_vm8, %v262_v51, %v264_v52 }
  0xbe   : > { %496 = vmatprep.subr.msk.bf16.mxu0 %vm268_vm1, %v267_v54  ;;  %v325_v55 = vsel %vm268_vm1, %v266_v53, 0 }
  0xbf   : > { %339 = vmatpush1.bf16.msra.mxu0 %v325_v55 }
  0xc2   : > { %497 = vmatmul.mubr.msk.bf16.vlgmr.msra.gmra.mrb[0].mxu0 %vm320_vm9, %v575_v56 }
  0xcd   : > { %v306_v57 = vpop.permute.xlu0 %305  ;;  %v311_v59 = vpop.permute.xlu1 %310 }
 0x195   : > { %v364_v58 = vpop.f32.mrb[0].mxu0  ;;  %387 = sbr.rel (!%p707_p5) target bundleno = 420 (0x1a4), region = 36 }
 0x196   : > { %v373_v60 = vadd.f32 %v364_v58, %v306_v57  ;;  %v366_v61 = vpop.f32.mrb[1].mxu0 }
 0x197   : > { %v374_v62 = vadd.f32 %v366_v61, %v306_v57  ;;  %v368_v63 = vpop.f32.mrb[2].mxu0 }
 0x198   : > { %377 = vst [vmem:[%s173_s10] sm:$0xff] %v373_v60  ;;  %v375_v0 = vadd.f32 %v368_v63, %v311_v59  ;;  %v370_v1 = vpop.f32.mrb[3].mxu0 }
 0x199   : > { %378 = vst [vmem:[%s173_s10 + $0x8] sm:$0xff] %v374_v62  ;;  %v376_v2 = vadd.f32 %v370_v1, %v311_v59 }
 0x19a   : > { %379 = vst [vmem:[%s173_s10 + $0x10] sm:$0xff] %v375_v0 }
 0x19b   : > { %380 = vst [vmem:[%s173_s10 + $0x18] sm:$0xff] %v376_v2 }
 0x19f   : > { %v405_v3 = vld [vmem:[%s173_s10] sm:$0xff] }
 0x1a0   : > { %v407_v4 = vld [vmem:[%s173_s10 + $0x8] sm:$0xff]  ;;  %406 = vst [vmem:[%s392_s26] sm:$0xff] %v405_v3 }
 0x1a1   : > { %v409_v5 = vld [vmem:[%s173_s10 + $0x10] sm:$0xff]  ;;  %408 = vst [vmem:[%s392_s26 + $0x8] sm:$0xff] %v407_v4 }
 0x1a2   : > { %v411_v6 = vld [vmem:[%s173_s10 + $0x18] sm:$0xff]  ;;  %410 = vst [vmem:[%s392_s26 + $0x20] sm:$0xff] %v409_v5 }
 0x1a3   : > { %412 = vst [vmem:[%s392_s26 + $0x28] sm:$0xff] %v411_v6 }
 0x1a4 PF: > { %s13_s18 = sadd.s32 1, %s630_s18   ;;  %s779_s12 = smov %s610_s13 }
 0x1a5   : > { %p10_p10 = scmp.ge.s32.totalorder %s13_s18, 6   ;;  %s780_s13 = smov %s718_s27 }
 0x1a6   : > { %s781_s14 = smov %s622_s16  ;;  %s782_s15 = smov %s626_s17 }
 0x1a7   : > { %s783_s16 = smov %s786_s19  ;;  %s784_s17 = smov %s790_s20 }
 0x1a8   :  { %12 = sbr.rel (!%p10_p10) target bundleno = 4 (0x4), region = 86 }

</bundles_post_ra>
